<compile_context>
chip_gen: v5e
topology: v5e:2x2
jax: 0.10.0
libtpu: 0.0.40
codegen_flags: <defaults>
</compile_context>

<pallas_src>
import functools

import jax
import jax.numpy as jnp
from jax.experimental import pallas as pl
from jax.experimental.pallas import tpu as pltpu


def _round_up(x, m):
    return ((x + m - 1) // m) * m


def _leaky_relu(h):
    # PyTorch default negative_slope = 0.01; max(h, 0.01*h) == where(h>0, h, 0.01*h).
    return jnp.maximum(h, 0.01 * h)


# ---------------------------------------------------------------------------
# Kernels
# ---------------------------------------------------------------------------

def _ffn_kernel_resident(x_ref, w1_ref, b1_ref, w2_ref, b2_ref, o_ref):
    """Whole padded d_ff is VMEM-resident: one fused step, no accumulator scratch."""
    x = x_ref[...].astype(w1_ref.dtype)                       # cast in-kernel (no XLA pass)
    h = jnp.dot(x, w1_ref[...], preferred_element_type=jnp.float32)
    h = _leaky_relu(h + b1_ref[...])
    # TODO(synk): dropout omitted -- identity in eval/inference; add pltpu.prng_* for training.
    out = jnp.dot(h.astype(w2_ref.dtype), w2_ref[...],
                  preferred_element_type=jnp.float32)
    o_ref[...] = (out + b2_ref[...]).astype(o_ref.dtype)


def _ffn_kernel_ktiled(x_ref, w1_ref, b1_ref, w2_ref, b2_ref, o_ref, acc_ref):
    """d_ff streamed in chunks along grid axis 1; f32 accumulator resident across it."""
    k = pl.program_id(1)

    @pl.when(k == 0)
    def _():
        # Fold the second bias into the accumulator init (saves a full final add pass).
        acc_ref[...] = jnp.broadcast_to(b2_ref[...], acc_ref.shape)

    x = x_ref[...].astype(w1_ref.dtype)
    h = jnp.dot(x, w1_ref[...], preferred_element_type=jnp.float32)
    h = _leaky_relu(h + b1_ref[...])
    # TODO(synk): dropout omitted -- identity in eval/inference; add pltpu.prng_* for training.
    acc_ref[...] += jnp.dot(h.astype(w2_ref.dtype), w2_ref[...],
                            preferred_element_type=jnp.float32)

    @pl.when(k == pl.num_programs(1) - 1)
    def _():
        o_ref[...] = acc_ref[...].astype(o_ref.dtype)


# ---------------------------------------------------------------------------
# Parameter preparation (run ONCE at setup -- not per forward call)
# ---------------------------------------------------------------------------

def prepare_ffn_params(w1, b1, w2, b2, *, compute_dtype=jnp.bfloat16):
    """Zero-pad feature dims to multiples of 128 and cast weights to the compute dtype.

    w1: [d_model, d_ff]; b1: [d_ff]; w2: [d_ff, d_model]; b2: [d_model].
    compute_dtype: dtype of the MXU matmul inputs (f32 accumulation either way);
                   pass None to keep the weights' own dtype (full-precision path).
    Returns (w1p, b1p, w2p, b2p) with biases as f32 row vectors.
    """
    d_model, d_ff = w1.shape
    cd = w1.dtype if compute_dtype is None else compute_dtype
    d_model_p = _round_up(d_model, 128)
    d_ff_p = _round_up(d_ff, 128)
    w1p = jnp.pad(w1, ((0, d_model_p - d_model), (0, d_ff_p - d_ff))).astype(cd)
    w2p = jnp.pad(w2, ((0, d_ff_p - d_ff), (0, d_model_p - d_model))).astype(cd)
    b1p = jnp.pad(b1, ((0, d_ff_p - d_ff),)).reshape(1, d_ff_p).astype(jnp.float32)
    b2p = jnp.pad(b2, ((0, d_model_p - d_model),)).reshape(1, d_model_p).astype(jnp.float32)
    return w1p, b1p, w2p, b2p


# ---------------------------------------------------------------------------
# Forward
# ---------------------------------------------------------------------------

@functools.partial(jax.jit,
                   static_argnames=("d_model", "tm", "tk", "force_stream_weights"))
def positionwise_ffn(x, w1p, b1p, w2p, b2p, *, d_model, tm=512, tk=512,
                     force_stream_weights=False):
    """x: [B, S, d_model] (native dtype); w1p/b1p/w2p/b2p from prepare_ffn_params()."""
    B, S, dm = x.shape
    assert dm == d_model
    d_model_p, d_ff_p = w1p.shape
    cd = w1p.dtype
    out_dtype = x.dtype
    M = B * S

    x_item = jnp.dtype(x.dtype).itemsize
    cd_item = jnp.dtype(cd).itemsize
    out_item = jnp.dtype(out_dtype).itemsize

    # --- token tile: round to the sublane-packing granularity of the compute dtype ---
    sub = {4: 8, 2: 16, 1: 32}.get(cd_item, 8)
    tm_eff = min(tm, _round_up(M, sub))
    # Give megacore / v7x's two TensorCores at least two token tiles when there's work.
    if M >= 256 and pl.cdiv(M, tm_eff) < 2:
        tm_eff = _round_up(pl.cdiv(M, 2), sub)
    n_i = pl.cdiv(M, tm_eff)

    # --- pad activations to a lane-dense feature width (no-op when d_model % 128 == 0)
    x2d = x.reshape(M, dm)
    if d_model_p != dm:
        x2d = jnp.pad(x2d, ((0, 0), (0, d_model_p - dm)))

    # --- VMEM budget & weight-residency decision --------------------------------------
    try:
        vmem_cap = int(pltpu.get_tpu_info().vmem_capacity_bytes)
    except Exception:
        vmem_cap = 64 * 1024 * 1024   # conservative v7x-sized floor if query unavailable
    weight_bytes = 2 * d_model_p * d_ff_p * cd_item
    bias_bytes = (d_ff_p + d_model_p) * 4
    tile_io_bytes = 2 * tm_eff * d_model_p * (x_item + out_item)  # double-buffered x/out
    h_bytes = tm_eff * d_ff_p * 4                                 # f32 intermediate slab
    # Pallas double-buffers every input block -> count weights twice to stay safe.
    resident_need = 2 * weight_bytes + 2 * bias_bytes + tile_io_bytes + h_bytes
    resident = (not force_stream_weights) and resident_need <= int(0.7 * vmem_cap)

    if resident:
        # ---- weights fully VMEM-resident: single fused step per token tile ----------
        vmem_limit = int(min(max(resident_need * 5 // 4, 32 * 1024 * 1024),
                             int(vmem_cap * 0.9)))
        cost = pl.CostEstimate(
            flops=4 * M * d_model_p * d_ff_p,
            transcendentals=0,
            bytes_accessed=(M * d_model_p * (x_item + out_item)    # x in, out out
                            + weight_bytes + bias_bytes))          # weights fetched once
        out2d = pl.pallas_call(
            _ffn_kernel_resident,
            out_shape=jax.ShapeDtypeStruct((M, d_model_p), out_dtype),
            grid_spec=pltpu.PrefetchScalarGridSpec(
                num_scalar_prefetch=0,
                grid=(n_i,),
                in_specs=[
                    pl.BlockSpec((tm_eff, d_model_p), lambda i: (i, 0)),   # x tile
                    pl.BlockSpec((d_model_p, d_ff_p), lambda i: (0, 0)),   # w1 (resident)
                    pl.BlockSpec((1, d_ff_p), lambda i: (0, 0)),           # b1
                    pl.BlockSpec((d_ff_p, d_model_p), lambda i: (0, 0)),   # w2 (resident)
                    pl.BlockSpec((1, d_model_p), lambda i: (0, 0)),        # b2
                ],
                out_specs=pl.BlockSpec((tm_eff, d_model_p), lambda i: (i, 0)),
            ),
            compiler_params=pltpu.CompilerParams(
                dimension_semantics=("parallel",),
                vmem_limit_bytes=vmem_limit),
            cost_estimate=cost,
        )(x2d, w1p, b1p, w2p, b2p)
    else:
        # ---- streaming fallback: tile d_ff, keep f32 accumulator resident across k --
        # Pick the largest multiple of 128 <= tk that divides the padded d_ff so the
        # prepared weights never need re-padding per call (128 always divides d_ff_p).
        tk_cap = max(128, (min(tk, d_ff_p) // 128) * 128)
        tk_eff = 128
        for t in range(tk_cap, 127, -128):
            if d_ff_p % t == 0:
                tk_eff = t
                break
        n_k = d_ff_p // tk_eff

        ktiled_need = (2 * (tm_eff * d_model_p * x_item           # x tiles
                            + d_model_p * tk_eff * cd_item        # w1 chunks
                            + tk_eff * d_model_p * cd_item        # w2 chunks
                            + tm_eff * d_model_p * out_item)      # out tiles
                       + 2 * (tk_eff + d_model_p) * 4             # bias tiles
                       + tm_eff * d_model_p * 4                   # acc scratch
                       + tm_eff * tk_eff * 4)                     # h slab
        vmem_limit = int(min(max(ktiled_need * 5 // 4, 32 * 1024 * 1024),
                             int(vmem_cap * 0.9)))
        cost = pl.CostEstimate(
            flops=4 * M * d_model_p * d_ff_p,
            transcendentals=0,
            bytes_accessed=(M * d_model_p * (x_item + out_item)
                            + n_i * weight_bytes                   # weights re-streamed
                            + n_i * bias_bytes))                   #   per token tile
        out2d = pl.pallas_call(
            _ffn_kernel_ktiled,
            out_shape=jax.ShapeDtypeStruct((M, d_model_p), out_dtype),
            grid_spec=pltpu.PrefetchScalarGridSpec(
                num_scalar_prefetch=0,
                grid=(n_i, n_k),
                in_specs=[
                    pl.BlockSpec((tm_eff, d_model_p), lambda i, k: (i, 0)),   # x tile
                    pl.BlockSpec((d_model_p, tk_eff), lambda i, k: (0, k)),   # w1 chunk
                    pl.BlockSpec((1, tk_eff), lambda i, k: (0, k)),           # b1 chunk
                    pl.BlockSpec((tk_eff, d_model_p), lambda i, k: (k, 0)),   # w2 chunk
                    pl.BlockSpec((1, d_model_p), lambda i, k: (0, 0)),        # b2
                ],
                out_specs=pl.BlockSpec((tm_eff, d_model_p), lambda i, k: (i, 0)),
                scratch_shapes=[pltpu.VMEM((tm_eff, d_model_p), jnp.float32)],
            ),
            compiler_params=pltpu.CompilerParams(
                dimension_semantics=("parallel", "arbitrary"),
                vmem_limit_bytes=vmem_limit),
            cost_estimate=cost,
        )(x2d, w1p, b1p, w2p, b2p)

    return out2d[:, :d_model].reshape(B, S, d_model)


# ---------------------------------------------------------------------------
# Reference + tests
# ---------------------------------------------------------------------------

def _reference(x, w1, b1, w2, b2):
    h = x @ w1 + b1
    h = jnp.where(h > 0, h, 0.01 * h)
    return h @ w2 + b2


def _make_params(key, d_model, d_ff):
    k1, kb1, k2, kb2 = jax.random.split(key, 4)
    bound1 = 1.0 / (d_model ** 0.5)
    w1 = jax.random.uniform(k1, (d_model, d_ff), jnp.float32, -bound1, bound1)
    b1 = jax.random.uniform(kb1, (d_ff,), jnp.float32, -bound1, bound1)
    bound2 = 1.0 / (d_ff ** 0.5)
    w2 = jax.random.uniform(k2, (d_ff, d_model), jnp.float32, -bound2, bound2)
    b2 = jax.random.uniform(kb2, (d_model,), jnp.float32, -bound2, bound2)
    return w1, b1, w2, b2


if __name__ == "__main__":
    jax.config.update("jax_default_matmul_precision", "highest")
    key = jax.random.PRNGKey(0)
    kx1, kp1, kx2, kp2 = jax.random.split(key, 4)

    # --- test 1: small module-sized config (resident kernel) -------------------------
    B, S, d_model, d_ff = 2, 8, 32, 64
    x = jax.random.normal(kx1, (B, S, d_model), dtype=jnp.float32)
    w1, b1, w2, b2 = _make_params(kp1, d_model, d_ff)
    ref = _reference(x, w1, b1, w2, b2)

    # full-precision datapath vs reference
    p_f32 = prepare_ffn_params(w1, b1, w2, b2, compute_dtype=None)
    out_f32 = jax.block_until_ready(positionwise_ffn(x, *p_f32, d_model=d_model))
    assert out_f32.shape == (B, S, d_model)
    assert jnp.allclose(out_f32, ref, atol=1e-2, rtol=1e-2), "f32 mismatch vs reference"

    # default bf16 matmul-input datapath (f32 MXU accumulation), looser tolerance
    p_bf16 = prepare_ffn_params(w1, b1, w2, b2)
    out_bf16 = jax.block_until_ready(positionwise_ffn(x, *p_bf16, d_model=d_model))
    assert jnp.allclose(out_bf16, ref, atol=5e-2, rtol=5e-2), "bf16 mismatch vs reference"

    # --- test 2: larger config exercising both kernels (resident and k-tiled) --------
    B2, S2, d_model2, d_ff2 = 2, 64, 256, 512
    x2 = jax.random.normal(kx2, (B2, S2, d_model2), dtype=jnp.float32)
    w1b, b1b, w2b, b2b = _make_params(kp2, d_model2, d_ff2)
    ref2 = _reference(x2, w1b, b1b, w2b, b2b)
    p2 = prepare_ffn_params(w1b, b1b, w2b, b2b)

    out_res = jax.block_until_ready(positionwise_ffn(x2, *p2, d_model=d_model2))
    assert out_res.shape == (B2, S2, d_model2)
    assert jnp.allclose(out_res, ref2, atol=5e-2, rtol=5e-2), "resident bf16 mismatch"

    out_stream = jax.block_until_ready(
        positionwise_ffn(x2, *p2, d_model=d_model2, tm=64, tk=256,
                         force_stream_weights=True))   # grid = (2, 2), accumulator path
    assert jnp.allclose(out_stream, ref2, atol=5e-2, rtol=5e-2), "k-tiled bf16 mismatch"

    print("KERNEL_OK")
</pallas_src>

<mosaic_0001>
module attributes {stable_mosaic.version = 11 : i64} {
  func.func @_ffn_kernel_resident(%arg0: i32, %arg1: memref<16x128xf32, #tpu.memory_space<vmem>>, %arg2: memref<128x128xf32, #tpu.memory_space<vmem>>, %arg3: memref<1x128xf32, #tpu.memory_space<vmem>>, %arg4: memref<128x128xf32, #tpu.memory_space<vmem>>, %arg5: memref<1x128xf32, #tpu.memory_space<vmem>>, %arg6: memref<16x128xf32, #tpu.memory_space<vmem>>) attributes {dimension_semantics = [#tpu.dimension_semantics<parallel>], iteration_bounds = array<i64: 1>, scalar_prefetch = 0 : i64, scratch_operands = 0 : i64, tpu.core_type = #tpu.core_type<tc>, window_params = [{transform_indices = @transform_0, window_bounds = array<i64: 16, 128>}, {pipeline_mode = #tpu.pipeline_mode<synchronous>, transform_indices = @transform_1, window_bounds = array<i64: 128, 128>}, {pipeline_mode = #tpu.pipeline_mode<synchronous>, transform_indices = @transform_2, window_bounds = array<i64: 1, 128>}, {pipeline_mode = #tpu.pipeline_mode<synchronous>, transform_indices = @transform_3, window_bounds = array<i64: 128, 128>}, {pipeline_mode = #tpu.pipeline_mode<synchronous>, transform_indices = @transform_4, window_bounds = array<i64: 1, 128>}, {transform_indices = @transform_5, window_bounds = array<i64: 16, 128>}]} {
    %c0 = arith.constant 0 : index
    %c0_0 = arith.constant 0 : index
    %0 = vector.load %arg1[%c0, %c0_0] : memref<16x128xf32, #tpu.memory_space<vmem>>, vector<16x128xf32>
    %c0_1 = arith.constant 0 : index
    %c0_2 = arith.constant 0 : index
    %1 = vector.load %arg2[%c0_1, %c0_2] : memref<128x128xf32, #tpu.memory_space<vmem>>, vector<128x128xf32>
    %cst = arith.constant dense<0.000000e+00> : vector<16x128xf32>
    %2 = tpu.matmul %0, %1, %cst {dimension_numbers = #tpu.dot_dimension_numbers<[1], [0], [0], [1], [0, 0, 1, 1], [], []>, precision = #tpu.contract_precision<fp32>} : vector<16x128xf32>, vector<128x128xf32>, vector<16x128xf32> -> vector<16x128xf32>
    %c0_3 = arith.constant 0 : index
    %c0_4 = arith.constant 0 : index
    %3 = vector.load %arg3[%c0_3, %c0_4] : memref<1x128xf32, #tpu.memory_space<vmem>>, vector<1x128xf32>
    %4 = vector.broadcast %3 : vector<1x128xf32> to vector<16x128xf32>
    %5 = arith.addf %2, %4 : vector<16x128xf32>
    %cst_5 = arith.constant 0.00999999977 : f32
    %6 = vector.broadcast %cst_5 : f32 to vector<16x128xf32>
    %7 = arith.mulf %6, %5 : vector<16x128xf32>
    %8 = arith.maximumf %5, %7 : vector<16x128xf32>
    %c0_6 = arith.constant 0 : index
    %c0_7 = arith.constant 0 : index
    %9 = vector.load %arg4[%c0_6, %c0_7] : memref<128x128xf32, #tpu.memory_space<vmem>>, vector<128x128xf32>
    %cst_8 = arith.constant dense<0.000000e+00> : vector<16x128xf32>
    %10 = tpu.matmul %8, %9, %cst_8 {dimension_numbers = #tpu.dot_dimension_numbers<[1], [0], [0], [1], [0, 0, 1, 1], [], []>, precision = #tpu.contract_precision<fp32>} : vector<16x128xf32>, vector<128x128xf32>, vector<16x128xf32> -> vector<16x128xf32>
    %c0_9 = arith.constant 0 : index
    %c0_10 = arith.constant 0 : index
    %11 = vector.load %arg5[%c0_9, %c0_10] : memref<1x128xf32, #tpu.memory_space<vmem>>, vector<1x128xf32>
    %12 = vector.broadcast %11 : vector<1x128xf32> to vector<16x128xf32>
    %13 = arith.addf %10, %12 : vector<16x128xf32>
    %c0_11 = arith.constant 0 : index
    %c0_12 = arith.constant 0 : index
    %14 = vector.load %arg6[%c0_11, %c0_12] : memref<16x128xf32, #tpu.memory_space<vmem>>, vector<16x128xf32>
    tpu.vector_store %arg6[%c0_11, %c0_12], %13 {strides = array<i32>} : memref<16x128xf32, #tpu.memory_space<vmem>>, vector<16x128xf32>,
    return
  }
  func.func @transform_0(%arg0: i32) -> (i32, i32) {
    %c0_i32 = arith.constant 0 : i32
    %c0_i32_0 = arith.constant 0 : i32
    return %arg0, %c0_i32 : i32, i32
  }
  func.func @transform_1(%arg0: i32) -> (i32, i32) {
    %c0_i32 = arith.constant 0 : i32
    %c0_i32_0 = arith.constant 0 : i32
    %c0_i32_1 = arith.constant 0 : i32
    return %c0_i32, %c0_i32_0 : i32, i32
  }
  func.func @transform_2(%arg0: i32) -> (i32, i32) {
    %c0_i32 = arith.constant 0 : i32
    %c0_i32_0 = arith.constant 0 : i32
    %c0_i32_1 = arith.constant 0 : i32
    return %c0_i32, %c0_i32_0 : i32, i32
  }
  func.func @transform_3(%arg0: i32) -> (i32, i32) {
    %c0_i32 = arith.constant 0 : i32
    %c0_i32_0 = arith.constant 0 : i32
    %c0_i32_1 = arith.constant 0 : i32
    return %c0_i32, %c0_i32_0 : i32, i32
  }
  func.func @transform_4(%arg0: i32) -> (i32, i32) {
    %c0_i32 = arith.constant 0 : i32
    %c0_i32_0 = arith.constant 0 : i32
    %c0_i32_1 = arith.constant 0 : i32
    return %c0_i32, %c0_i32_0 : i32, i32
  }
  func.func @transform_5(%arg0: i32) -> (i32, i32) {
    %c0_i32 = arith.constant 0 : i32
    %c0_i32_0 = arith.constant 0 : i32
    return %arg0, %c0_i32 : i32, i32
  }
}

</mosaic_0001>

<bundles_post_ra>
// kernel: positionwise_ffn.1
= control target key start
LH: loop header
LB: loop body
LE: loop exit
PB: predicated region body
PF: predicated region fallthrough
CT: control target
= control target key end

     0   :  { %10 = vsyncpa [#allocation3], 0  ;;  %s1422_s0 = inlined_call_operand.vmem [shape: f32[16,128], index: 0, kind: input, shape index: {}]   ;;  %s1423_s1 = inlined_call_operand.hbm [shape: f32[128,128], index: 1, kind: input, shape index: {}]   ;;  %s1424_s2 = inlined_call_operand.vmem [shape: f32[1,128], index: 2, kind: input, shape index: {}]   ;;  %s1425_s3 = inlined_call_operand.hbm [shape: f32[128,128], index: 3, kind: input, shape index: {}]   ;;  %s1426_s4 = inlined_call_operand.vmem [shape: f32[1,128], index: 4, kind: input, shape index: {}]   ;;  %s1427_s5 = inlined_call_operand.vmem [shape: f32[16,128], index: 5, kind: output, shape index: {}]  }
   0x1   :  { %s18_s20 = sshll.u32 %s1423_s1, 4  ;;  %s19_s20 = int_to_ptr.hbm [resolvable:$true] %s18_s20 }
   0x2   :  { %11 = vsyncpa [#allocation5], 0  ;;  %s908_s21 = smov [#allocation2]   ;;  %s33_s25 = sshll.u32 %s1425_s3, 4  ;;  %s34_s25 = int_to_ptr.hbm [resolvable:$true] %s33_s25 }
   0x3   :  { %s20_s22 = sshll.u32 %s908_s21, 4  ;;  %s909_s26 = smov 128   ;;  %s21_s22 = int_to_ptr.vmem [resolvable:$true] %s20_s22 }
   0x4   :  { %s910_s27 = smov 8   ;;  %s911_s28 = smov [#allocation4]  }
   0x5   :  { %26 = dma.hbm_to_vmem [thread:$0]  %s19_s20, 2048, %s21_s22, [#allocation3], %s909_s26, %s909_s26, %s910_s27  }
   0x6   :  { %s35_s29 = sshll.u32 %s911_s28, 4  ;;  %s36_s29 = int_to_ptr.vmem [resolvable:$true] %s35_s29 }
   0x7   :  { %41 = dma.hbm_to_vmem [thread:$0]  %s34_s25, 2048, %s36_s29, [#allocation5], %s909_s26, %s909_s26, %s910_s27  }
   0x8   :  { %904 = dma.done.wait [#allocation3], 2048  }
   0x9   :  { %905 = vsyncadd [#allocation3], 4294965248 }
   0xa   :  { %906 = dma.done.wait [#allocation5], 2048  }
   0xb   :  { %907 = vsyncadd [#allocation5], 4294965248  ;;  %v69_v0 = vld [vmem:[#allocation2 + $0x78] sm:$0xff]  ;;  %v68_v1 = vld [vmem:[#allocation2 + $0x70] sm:$0xff] }
   0xc   :  { %v67_v2 = vld [vmem:[#allocation2 + $0x68] sm:$0xff]  ;;  %v948_v3 = vand.u32 4294901760, %v69_v0  ;;  %v950_v4 = vand.u32 4294901760, %v68_v1  ;;  %v66_v6 = vld [vmem:[#allocation2 + $0x60] sm:$0xff]  ;;  %v65_v7 = vld [vmem:[#allocation2 + $0x58] sm:$0xff] }
   0xd   :  { %v952_v5 = vand.u32 4294901760, %v67_v2  ;;  %v64_v8 = vld [vmem:[#allocation2 + $0x50] sm:$0xff]  ;;  %v954_v9 = vand.u32 4294901760, %v66_v6  ;;  %v956_v10 = vand.u32 4294901760, %v65_v7  ;;  %v63_v12 = vld [vmem:[#allocation2 + $0x48] sm:$0xff]  ;;  %v62_v13 = vld [vmem:[#allocation2 + $0x40] sm:$0xff] }
   0xe   :  { %v958_v11 = vand.u32 4294901760, %v64_v8  ;;  %75 = vmatpush.msra.mxu0 %v948_v3  ;;  %v962_v14 = vsub.f32 %v69_v0, %v948_v3  ;;  %v965_v15 = vsub.f32 %v68_v1, %v950_v4  ;;  %v967_v16 = vand.u32 4294901760, %v63_v12  ;;  %v61_v18 = vld [vmem:[#allocation2 + $0x38] sm:$0xff]  ;;  %288 = vmatpush.msra.mxu3 %v948_v3  ;;  %v60_v25 = vld [vmem:[#allocation2 + $0x30] sm:$0xff]  ;;  %v59_v33 = vld [vmem:[#allocation2 + $0x28] sm:$0xff] }
   0xf   :  { %v970_v17 = vsub.f32 %v67_v2, %v952_v5  ;;  %v974_v19 = vsub.f32 %v66_v6, %v954_v9  ;;  %v977_v20 = vsub.f32 %v65_v7, %v956_v10  ;;  %v983_v24 = vand.u32 4294901760, %v62_v13  ;;  %v58_v40 = vld [vmem:[#allocation2 + $0x20] sm:$0xff]  ;;  %v57_v46 = vld [vmem:[#allocation2 + $0x18] sm:$0xff]  ;;  %v56_v52 = vld [vmem:[#allocation2 + $0x10] sm:$0xff] }
  0x10   :  { %77 = vmatpush.msra.mxu0 %v950_v4  ;;  %v125_v21 = vand.u32 4294901760, %v962_v14  ;;  %v131_v22 = vand.u32 4294901760, %v965_v15  ;;  %230 = vmatpush.msra.mxu2 %v962_v14  ;;  %v987_v27 = vand.u32 4294901760, %v61_v18  ;;  %v991_v29 = vsub.f32 %v64_v8, %v958_v11  ;;  %v55_v58 = vld [vmem:[#allocation2 + $0x8] sm:$0xff]  ;;  %v52_v61 = vld [vmem:[%s1422_s0] sm:$0xff] }
  0x11   :  { %v137_v23 = vand.u32 4294901760, %v970_v17  ;;  %v143_v26 = vand.u32 4294901760, %v974_v19  ;;  %v149_v28 = vand.u32 4294901760, %v977_v20  ;;  %290 = vmatpush.msra.mxu3 %v950_v4  ;;  %v1005_v34 = vsub.f32 %v63_v12, %v967_v16  ;;  %v54_v1 = vld [vmem:[#allocation2] sm:$0xff] }
  0x12   :  { %79 = vmatpush.msra.mxu0 %v952_v5  ;;  %v126_v30 = vsub.f32 %v962_v14, %v125_v21  ;;  %v132_v31 = vsub.f32 %v965_v15, %v131_v22  ;;  %v1007_v35 = vand.u32 4294901760, %v60_v25  ;;  %233 = vmatpush.msra.mxu2 %v965_v15  ;;  %v155_v39 = vand.u32 4294901760, %v991_v29  ;;  %v464_v15 = vld [vmem:[#allocation4 + $0x70] sm:$0xff] }
  0x13   :  { %v138_v32 = vsub.f32 %v970_v17, %v137_v23  ;;  %292 = vmatpush.msra.mxu3 %v952_v5  ;;  %v144_v38 = vsub.f32 %v974_v19, %v143_v26  ;;  %v1016_v41 = vand.u32 4294901760, %v59_v33  ;;  %v1019_v42 = vsub.f32 %v62_v13, %v983_v24 }
  0x14   :  { %81 = vmatpush.msra.mxu0 %v954_v9  ;;  %v127_v36 = vand.u32 4294901760, %v126_v30  ;;  %v133_v37 = vand.u32 4294901760, %v132_v31  ;;  %236 = vmatpush.msra.mxu2 %v970_v17  ;;  %v150_v44 = vsub.f32 %v977_v20, %v149_v28  ;;  %v161_v45 = vand.u32 4294901760, %v1005_v34  ;;  %v53_v31 = vld [vmem:[%s1422_s0 + $0x8] sm:$0xff] }
  0x15   :  { %294 = vmatpush.msra.mxu3 %v954_v9  ;;  %v139_v43 = vand.u32 4294901760, %v138_v32  ;;  %v1029_v47 = vsub.f32 %v61_v18, %v987_v27  ;;  %v1031_v48 = vand.u32 4294901760, %v58_v40  ;;  %v145_v49 = vand.u32 4294901760, %v144_v38  ;;  %v463_v17 = vld [vmem:[#allocation4 + $0x68] sm:$0xff] }
  0x16   :  { %83 = vmatpush.msra.mxu0 %v956_v10  ;;  %128 = vmatpush.msra.mxu1 %v127_v36  ;;  %v156_v50 = vsub.f32 %v991_v29, %v155_v39  ;;  %v167_v51 = vand.u32 4294901760, %v1019_v42  ;;  %v1041_v53 = vsub.f32 %v60_v25, %v1007_v35  ;;  %v1043_v54 = vand.u32 4294901760, %v57_v46 }
  0x17   :  { %239 = vmatpush.msra.mxu2 %v974_v19  ;;  %296 = vmatpush.msra.mxu3 %v956_v10  ;;  %v151_v55 = vand.u32 4294901760, %v150_v44  ;;  %v162_v56 = vsub.f32 %v1005_v34, %v161_v45  ;;  %v173_v57 = vand.u32 4294901760, %v1029_v47  ;;  %v1053_v59 = vsub.f32 %v59_v33, %v1016_v41 }
  0x18   :  { %85 = vmatpush.msra.mxu0 %v958_v11  ;;  %134 = vmatpush.msra.mxu1 %v133_v37  ;;  %v1055_v60 = vand.u32 4294901760, %v56_v52  ;;  %v157_v62 = vand.u32 4294901760, %v156_v50  ;;  %v168_v63 = vsub.f32 %v1019_v42, %v167_v51  ;;  %v179_v0 = vand.u32 4294901760, %v1041_v53 }
  0x19   :  { %242 = vmatpush.msra.mxu2 %v977_v20  ;;  %298 = vmatpush.msra.mxu3 %v958_v11  ;;  %v1068_v2 = vsub.f32 %v58_v40, %v1031_v48  ;;  %v1070_v6 = vand.u32 4294901760, %v55_v58  ;;  %v1074_v7 = vsub.f32 %v57_v46, %v1043_v54  ;;  %v163_v8 = vand.u32 4294901760, %v162_v56 }
  0x1a   :  { %87 = vmatpush.msra.mxu0 %v967_v16  ;;  %140 = vmatpush.msra.mxu1 %v139_v43  ;;  %v174_v12 = vsub.f32 %v1029_v47, %v173_v57  ;;  %v185_v13 = vand.u32 4294901760, %v1053_v59  ;;  %v1082_v18 = vand.u32 4294901760, %v52_v61  ;;  %v1084_v25 = vand.u32 4294901760, %v54_v1 }
  0x1b   :  { %245 = vmatpush.msra.mxu2 %v991_v29  ;;  %300 = vmatpush.msra.mxu3 %v967_v16  ;;  %v1088_v30 = vsub.f32 %v56_v52, %v1055_v60  ;;  %v169_v32 = vand.u32 4294901760, %v168_v63  ;;  %v180_v33 = vsub.f32 %v1041_v53, %v179_v0  ;;  %v191_v36 = vand.u32 4294901760, %v1068_v2 }
  0x1c   :  { %89 = vmatpush.msra.mxu0 %v983_v24  ;;  %146 = vmatpush.msra.mxu1 %v145_v49  ;;  %v1100_v37 = vsub.f32 %v52_v61, %v1082_v18  ;;  %v197_v38 = vand.u32 4294901760, %v1074_v7  ;;  %v1105_v40 = vsub.f32 %v55_v58, %v1070_v6  ;;  %v175_v43 = vand.u32 4294901760, %v174_v12 }
  0x1d   :  { %248 = vmatpush.msra.mxu2 %v1005_v34  ;;  %302 = vmatpush.msra.mxu3 %v983_v24  ;;  %v186_v44 = vsub.f32 %v1053_v59, %v185_v13  ;;  %v1113_v49 = vand.u32 4294901760, %v53_v31  ;;  %v181_v50 = vand.u32 4294901760, %v180_v33  ;;  %v192_v52 = vsub.f32 %v1068_v2, %v191_v36 }
  0x1e   :  { %91 = vmatpush.msra.mxu0 %v987_v27  ;;  %152 = vmatpush.msra.mxu1 %v151_v55  ;;  %v108_v46 = vand.u32 4294901760, %v1100_v37  ;;  %v203_v55 = vand.u32 4294901760, %v1088_v30  ;;  %v1123_v56 = vsub.f32 %v54_v1, %v1084_v25  ;;  %v209_v58 = vand.u32 4294901760, %v1105_v40 }
  0x1f   :  { %251 = vmatpush.msra.mxu2 %v1019_v42  ;;  %304 = vmatpush.msra.mxu3 %v987_v27  ;;  %v187_v61 = vand.u32 4294901760, %v186_v44  ;;  %v193_v1 = vand.u32 4294901760, %v192_v52  ;;  %v1183_v19 = vand.u32 4294901760, %v464_v15  ;;  %v1185_v20 = vand.u32 4294901760, %v463_v17 }
  0x20   :  { %93 = vmatpush.msra.mxu0 %v1007_v35  ;;  %158 = vmatpush.msra.mxu1 %v157_v62  ;;  %v198_v62 = vsub.f32 %v1074_v7, %v197_v38  ;;  %v109_v63 = vsub.f32 %v1100_v37, %v108_v46  ;;  %v204_v12 = vsub.f32 %v1088_v30, %v203_v55 }
  0x21   :  { %254 = vmatpush.msra.mxu2 %v1029_v47  ;;  %306 = vmatpush.msra.mxu3 %v1007_v35  ;;  %v210_v33 = vsub.f32 %v1105_v40, %v209_v58  ;;  %v1201_v29 = vsub.f32 %v464_v15, %v1183_v19  ;;  %v1204_v34 = vsub.f32 %v463_v17, %v1185_v20  ;;  %v453_v17 = vld [vmem:[#allocation4 + $0x18] sm:$0xff] }
  0x22   :  { %95 = vmatpush.msra.mxu0 %v1016_v41  ;;  %164 = vmatpush.msra.mxu1 %v163_v8  ;;  %v115_v8 = vsub.f32 %v53_v31, %v1113_v49  ;;  %v199_v31 = vand.u32 4294901760, %v198_v62 }
  0x23   :  { %257 = vmatpush.msra.mxu2 %v1041_v53  ;;  %308 = vmatpush.msra.mxu3 %v1016_v41  ;;  %v533_v47 = vand.u32 4294901760, %v1204_v34 }
  0x24   :  { %97 = vmatpush.msra.mxu0 %v1031_v48  ;;  %170 = vmatpush.msra.mxu1 %v169_v32  ;;  %v215_v32 = vand.u32 4294901760, %v1123_v56  ;;  %v116_v44 = vand.u32 4294901760, %v115_v8 }
  0x25   :  { %260 = vmatpush.msra.mxu2 %v1053_v59  ;;  %310 = vmatpush.msra.mxu3 %v1031_v48 }
  0x26   :  { %99 = vmatpush.msra.mxu0 %v1043_v54  ;;  %176 = vmatpush.msra.mxu1 %v175_v43  ;;  %v110_v43 = vand.u32 4294901760, %v109_v63  ;;  %v216_v52 = vsub.f32 %v1123_v56, %v215_v32  ;;  %v117_v62 = vsub.f32 %v115_v8, %v116_v44 }
  0x27   :  { %263 = vmatpush.msra.mxu2 %v1068_v2  ;;  %312 = vmatpush.msra.mxu3 %v1043_v54 }
  0x28   :  { %101 = vmatpush.msra.mxu0 %v1055_v60  ;;  %182 = vmatpush.msra.mxu1 %v181_v50  ;;  %v205_v50 = vand.u32 4294901760, %v204_v12  ;;  %v217_v63 = vand.u32 4294901760, %v216_v52  ;;  %v118_v14 = vand.u32 4294901760, %v117_v62 }
  0x29   :  { %266 = vmatpush.msra.mxu2 %v1074_v7  ;;  %314 = vmatpush.msra.mxu3 %v1055_v60 }
  0x2a   :  { %103 = vmatpush.msra.mxu0 %v1070_v6  ;;  %188 = vmatpush.msra.mxu1 %v187_v61  ;;  %v211_v61 = vand.u32 4294901760, %v210_v33 }
  0x2b   :  { %269 = vmatpush.msra.mxu2 %v1088_v30  ;;  %316 = vmatpush.msra.mxu3 %v1070_v6 }
  0x2c   :  { %105 = vmatpush.msra.mxu0 %v1084_v25  ;;  %194 = vmatpush.msra.mxu1 %v193_v1 }
  0x2d   :  { %272 = vmatpush.msra.mxu2 %v1105_v40  ;;  %111 = vmatmul.f32.vlgmr.msra.gmra.mxu0 %v110_v43 }
  0x2e   :  { %335 = vmatpush.msrb.mxu0 %v125_v21  ;;  %200 = vmatpush.msra.mxu1 %v199_v31  ;;  %v461_v21 = vld [vmem:[#allocation4 + $0x58] sm:$0xff] }
  0x2f   :  { %275 = vmatpush.msra.mxu2 %v1123_v56  ;;  %318 = vmatpush.msra.mxu3 %v1084_v25 }
  0x30   :  { %339 = vmatpush.msrb.mxu0 %v131_v22  ;;  %206 = vmatpush.msra.mxu1 %v205_v50  ;;  %v460_v22 = vld [vmem:[#allocation4 + $0x50] sm:$0xff] }
  0x31   :  { %278 = vmatmul.f32.vlgmr.msra.gmra.mxu2 %v1100_v37  ;;  %322 = vmatmul.f32.vlgmr.msra.gmra.mxu3 %v108_v46 }
  0x32   :  { %343 = vmatpush.msrb.mxu0 %v137_v23  ;;  %212 = vmatpush.msra.mxu1 %v211_v61  ;;  %v1190_v23 = vand.u32 4294901760, %v461_v21 }
  0x34   :  { %347 = vmatpush.msrb.mxu0 %v143_v26  ;;  %218 = vmatpush.msra.mxu1 %v217_v63  ;;  %v1192_v26 = vand.u32 4294901760, %v460_v22  ;;  %v1211_v42 = vsub.f32 %v461_v21, %v1190_v23  ;;  %v454_v63 = vld [vmem:[#allocation4 + $0x20] sm:$0xff] }
  0x35   :  { %119 = vmatmul.f32.gmra.mxu0 %v118_v14  ;;  %220 = vmatmul.f32.vlgmr.msra.gmra.mxu1 %v1082_v18  ;;  %v1339_v15 = vand.u32 4294901760, %v454_v63 }
  0x36   :  { %351 = vmatpush.msrb.mxu0 %v149_v28  ;;  %406 = vmatpush.msrb.mxu1 %v948_v3  ;;  %v465_v3 = vld [vmem:[#allocation4 + $0x78] sm:$0xff]  ;;  %v459_v28 = vld [vmem:[#allocation4 + $0x48] sm:$0xff] }
  0x37   :  { %v1345_v21 = vsub.f32 %v454_v63, %v1339_v15 }
  0x38   :  { %355 = vmatpush.msrb.mxu0 %v155_v39  ;;  %408 = vmatpush.msrb.mxu1 %v950_v4  ;;  %v1181_v4 = vand.u32 4294901760, %v465_v3 }
  0x39   :  { %283 = vmatmul.f32.gmra.mxu2 %v115_v8  ;;  %328 = vmatmul.f32.gmra.mxu3 %v116_v44 }
  0x3a   :  { %359 = vmatpush.msrb.mxu0 %v161_v45  ;;  %410 = vmatpush.msrb.mxu1 %v952_v5  ;;  %v462_v5 = vld [vmem:[#allocation4 + $0x60] sm:$0xff]  ;;  %v527_v45 = vand.u32 4294901760, %v1201_v29 }
  0x3b   :  { %471 = vmatpush.msrb.mxu2 %v1181_v4 }
  0x3c   :  { %363 = vmatpush.msrb.mxu0 %v167_v51  ;;  %412 = vmatpush.msrb.mxu1 %v954_v9  ;;  %v1188_v9 = vand.u32 4294901760, %v462_v5  ;;  %v1219_v51 = vand.u32 4294901760, %v459_v28  ;;  %v528_v59 = vsub.f32 %v1201_v29, %v527_v45 }
  0x3d   :  { %224 = vmatmul.f32.gmra.mxu1 %v1113_v49  ;;  %473 = vmatpush.msrb.mxu2 %v1183_v19 }
  0x3e   :  { %367 = vmatpush.msrb.mxu0 %v173_v57  ;;  %414 = vmatpush.msrb.mxu1 %v956_v10  ;;  %v1198_v10 = vsub.f32 %v465_v3, %v1181_v4  ;;  %v1207_v39 = vsub.f32 %v462_v5, %v1188_v9  ;;  %v1224_v57 = vsub.f32 %v460_v22, %v1192_v26  ;;  %v1347_v22 = vand.u32 4294901760, %v453_v17 }
  0x3f   :  { %475 = vmatpush.msrb.mxu2 %v1185_v20  ;;  %v1244_v2 = vsub.f32 %v459_v28, %v1219_v51 }
  0x40   :  { %371 = vmatpush.msrb.mxu0 %v179_v0  ;;  %416 = vmatpush.msrb.mxu1 %v958_v11  ;;  %v521_v11 = vand.u32 4294901760, %v1198_v10  ;;  %v539_v53 = vand.u32 4294901760, %v1207_v39  ;;  %v534_v0 = vsub.f32 %v1204_v34, %v533_v47  ;;  %v551_v46 = vand.u32 4294901760, %v1224_v57 }
  0x41   :  { %477 = vmatpush.msrb.mxu2 %v1188_v9 }
  0x42   :  { %375 = vmatpush.msrb.mxu0 %v185_v13  ;;  %418 = vmatpush.msrb.mxu1 %v967_v16  ;;  %v522_v16 = vsub.f32 %v1198_v10, %v521_v11  ;;  %v545_v13 = vand.u32 4294901760, %v1211_v42  ;;  %v540_v37 = vsub.f32 %v1207_v39, %v539_v53 }
  0x43   :  { %479 = vmatpush.msrb.mxu2 %v1190_v23 }
  0x44   :  { %379 = vmatpush.msrb.mxu0 %v191_v36  ;;  %420 = vmatpush.msrb.mxu1 %v983_v24  ;;  %v523_v24 = vand.u32 4294901760, %v522_v16  ;;  %v529_v36 = vand.u32 4294901760, %v528_v59  ;;  %v546_v7 = vsub.f32 %v1211_v42, %v545_v13  ;;  %v541_v30 = vand.u32 4294901760, %v540_v37  ;;  %v452_v16 = vld [vmem:[#allocation4 + $0x10] sm:$0xff]  ;;  %v451_v59 = vld [vmem:[#allocation4 + $0x8] sm:$0xff] }
  0x45   :  { %481 = vmatpush.msrb.mxu2 %v1192_v26  ;;  %v1358_v37 = vand.u32 4294901760, %v451_v59 }
  0x46   :  { %383 = vmatpush.msrb.mxu0 %v197_v38  ;;  %422 = vmatpush.msrb.mxu1 %v987_v27  ;;  %v535_v27 = vand.u32 4294901760, %v534_v0  ;;  %v557_v38 = vand.u32 4294901760, %v1244_v2  ;;  %v547_v40 = vand.u32 4294901760, %v546_v7  ;;  %v587_v0 = vand.u32 4294901760, %v1345_v21 }
  0x47   :  { %524 = vmatpush.msrb.mxu3 %v523_v24  ;;  %483 = vmatpush.msrb.mxu2 %v1219_v51  ;;  %v1354_v24 = vsub.f32 %v453_v17, %v1347_v22 }
  0x48   :  { %387 = vmatpush.msrb.mxu0 %v203_v55  ;;  %424 = vmatpush.msrb.mxu1 %v1007_v35  ;;  %v552_v35 = vsub.f32 %v1224_v57, %v551_v46 }
  0x49   :  { %530 = vmatpush.msrb.mxu3 %v529_v36  ;;  %v1356_v36 = vand.u32 4294901760, %v452_v16  ;;  %v593_v7 = vand.u32 4294901760, %v1354_v24 }
  0x4a   :  { %391 = vmatpush.msrb.mxu0 %v209_v58  ;;  %426 = vmatpush.msrb.mxu1 %v1016_v41  ;;  %v558_v41 = vsub.f32 %v1244_v2, %v557_v38  ;;  %v553_v55 = vand.u32 4294901760, %v552_v35  ;;  %v455_v58 = vld [vmem:[#allocation4 + $0x28] sm:$0xff]  ;;  %v604_v35 = vsub.f32 %v451_v59, %v1358_v37  ;;  %v855_v59 = vld [vmem:[%s1426_s4] ss:$0 sm:$0xff] }
  0x4b   :  { %536 = vmatpush.msrb.mxu3 %v535_v27  ;;  %v1301_v8 = vand.u32 4294901760, %v455_v58  ;;  %v588_v27 = vsub.f32 %v1345_v21, %v587_v0 }
  0x4c   :  { %395 = vmatpush.msrb.mxu0 %v215_v32  ;;  %428 = vmatpush.msrb.mxu1 %v1031_v48  ;;  %v559_v48 = vand.u32 4294901760, %v558_v41  ;;  %v594_v41 = vsub.f32 %v1354_v24, %v593_v7 }
  0x4d   :  { %397 = vmatmul.f32.vlgmr.msrb.gmra.mxu0 %v1082_v18  ;;  %542 = vmatpush.msrb.mxu3 %v541_v30  ;;  %v1315_v32 = vsub.f32 %v455_v58, %v1301_v8  ;;  %v598_v30 = vsub.f32 %v452_v16, %v1356_v36  ;;  %v450_v58 = vld [vmem:[#allocation4] sm:$0xff] }
  0x4e   :  { %430 = vmatpush.msrb.mxu1 %v1043_v54  ;;  %626 = vmatpush.msra.mxu0 %v1198_v10  ;;  %v458_v54 = vld [vmem:[#allocation4 + $0x40] sm:$0xff] }
  0x4f   :  { %548 = vmatpush.msrb.mxu3 %v547_v40  ;;  %v581_v44 = vand.u32 4294901760, %v1315_v32  ;;  %v589_v40 = vand.u32 4294901760, %v588_v27 }
  0x50   :  { %432 = vmatpush.msrb.mxu1 %v1055_v60  ;;  %629 = vmatpush.msra.mxu0 %v1201_v29  ;;  %v457_v60 = vld [vmem:[#allocation4 + $0x38] sm:$0xff] }
  0x51   :  { %554 = vmatpush.msrb.mxu3 %v553_v55  ;;  %v582_v62 = vsub.f32 %v1315_v32, %v581_v44  ;;  %v599_v55 = vand.u32 4294901760, %v598_v30 }
  0x52   :  { %434 = vmatpush.msrb.mxu1 %v1070_v6  ;;  %632 = vmatpush.msra.mxu0 %v1204_v34  ;;  %v456_v6 = vld [vmem:[#allocation4 + $0x30] sm:$0xff] }
  0x53   :  { %560 = vmatpush.msrb.mxu3 %v559_v48  ;;  %v1299_v56 = vand.u32 4294901760, %v456_v6  ;;  %v583_v28 = vand.u32 4294901760, %v582_v62  ;;  %v605_v48 = vand.u32 4294901760, %v604_v35 }
  0x54   :  { %436 = vmatpush.msrb.mxu1 %v1084_v25  ;;  %635 = vmatpush.msra.mxu0 %v1207_v39  ;;  %v1297_v25 = vand.u32 4294901760, %v457_v60 }
  0x55   :  { %401 = vmatmul.f32.gmra.mxu0 %v1113_v49  ;;  %438 = vmatmul.f32.vlgmr.msrb.gmra.mxu1 %v1082_v18  ;;  %v1295_v18 = vand.u32 4294901760, %v458_v54  ;;  %v1310_v12 = vsub.f32 %v456_v6, %v1299_v56  ;;  %v606_v6 = vsub.f32 %v604_v35, %v605_v48 }
  0x56   :  { %684 = vmatpush.msra.mxu1 %v1181_v4  ;;  %638 = vmatpush.msra.mxu0 %v1211_v42  ;;  %v1307_v1 = vsub.f32 %v457_v60, %v1297_v25  ;;  %v600_v60 = vsub.f32 %v598_v30, %v599_v55 }
  0x57   :  { %485 = vmatpush.msrb.mxu2 %v1295_v18  ;;  %v575_v43 = vand.u32 4294901760, %v1310_v12 }
  0x58   :  { %686 = vmatpush.msra.mxu1 %v1183_v19  ;;  %641 = vmatpush.msra.mxu0 %v1224_v57  ;;  %v569_v33 = vand.u32 4294901760, %v1307_v1 }
  0x59   :  { %487 = vmatpush.msrb.mxu2 %v1297_v25  ;;  %v576_v61 = vsub.f32 %v1310_v12, %v575_v43 }
  0x5a   :  { %688 = vmatpush.msra.mxu1 %v1185_v20  ;;  %644 = vmatpush.msra.mxu0 %v1244_v2  ;;  %v570_v52 = vsub.f32 %v1307_v1, %v569_v33 }
  0x5b   :  { %489 = vmatpush.msrb.mxu2 %v1299_v56  ;;  %v577_v5 = vand.u32 4294901760, %v576_v61  ;;  %v607_v61 = vand.u32 4294901760, %v606_v6 }
  0x5c   :  { %690 = vmatpush.msra.mxu1 %v1188_v9  ;;  %v571_v3 = vand.u32 4294901760, %v570_v52  ;;  %v601_v52 = vand.u32 4294901760, %v600_v60 }
  0x5d   :  { %442 = vmatmul.f32.gmra.mxu1 %v1113_v49  ;;  %v1304_v49 = vsub.f32 %v458_v54, %v1295_v18  ;;  %491 = vmatpush.msrb.mxu2 %v1301_v8  ;;  %v595_v54 = vand.u32 4294901760, %v594_v41 }
  0x5e   :  { %692 = vmatpush.msra.mxu1 %v1190_v23 }
  0x5f   :  { %v563_v31 = vand.u32 4294901760, %v1304_v49  ;;  %647 = vmatpush.msra.mxu0 %v1304_v49  ;;  %493 = vmatpush.msrb.mxu2 %v1339_v15 }
  0x60   :  { %694 = vmatpush.msra.mxu1 %v1192_v26 }
  0x61   :  { %v564_v50 = vsub.f32 %v1304_v49, %v563_v31  ;;  %650 = vmatpush.msra.mxu0 %v1307_v1  ;;  %495 = vmatpush.msrb.mxu2 %v1347_v22 }
  0x62   :  { %696 = vmatpush.msra.mxu1 %v1219_v51 }
  0x63   :  { %v565_v14 = vand.u32 4294901760, %v564_v50  ;;  %653 = vmatpush.msra.mxu0 %v1310_v12  ;;  %497 = vmatpush.msrb.mxu2 %v1356_v36  ;;  %v500_v50 = vand.u32 4294901760, %v450_v58 }
  0x64   :  { %698 = vmatpush.msra.mxu1 %v1295_v18 }
  0x65   :  { %566 = vmatpush.msrb.mxu3 %v565_v14  ;;  %656 = vmatpush.msra.mxu0 %v1315_v32  ;;  %v610_v62 = vsub.f32 %v450_v58, %v500_v50 }
  0x66   :  { %700 = vmatpush.msra.mxu1 %v1297_v25  ;;  %499 = vmatpush.msrb.mxu2 %v1358_v37 }
  0x67   :  { %572 = vmatpush.msrb.mxu3 %v571_v3  ;;  %659 = vmatpush.msra.mxu0 %v1345_v21  ;;  %v611_v63 = vand.u32 4294901760, %v610_v62 }
  0x68   :  { %702 = vmatpush.msra.mxu1 %v1299_v56  ;;  %501 = vmatpush.msrb.mxu2 %v500_v50 }
  0x69   :  { %578 = vmatpush.msrb.mxu3 %v577_v5  ;;  %662 = vmatpush.msra.mxu0 %v1354_v24  ;;  %v612_v14 = vsub.f32 %v610_v62, %v611_v63 }
  0x6a   :  { %704 = vmatpush.msra.mxu1 %v1301_v8  ;;  %731 = vmatpush.msra.mxu2 %v521_v11 }
  0x6b   :  { %584 = vmatpush.msrb.mxu3 %v583_v28  ;;  %665 = vmatpush.msra.mxu0 %v598_v30  ;;  %v613_v3 = vand.u32 4294901760, %v612_v14 }
  0x6c   :  { %706 = vmatpush.msra.mxu1 %v1339_v15  ;;  %735 = vmatpush.msra.mxu2 %v527_v45 }
  0x6d   :  { %590 = vmatpush.msrb.mxu3 %v589_v40  ;;  %668 = vmatpush.msra.mxu0 %v604_v35 }
  0x6e   :  { %708 = vmatpush.msra.mxu1 %v1347_v22  ;;  %739 = vmatpush.msra.mxu2 %v533_v47 }
  0x6f   :  { %596 = vmatpush.msrb.mxu3 %v595_v54  ;;  %671 = vmatpush.msra.mxu0 %v610_v62 }
  0x70   :  { %710 = vmatpush.msra.mxu1 %v1356_v36  ;;  %743 = vmatpush.msra.mxu2 %v539_v53 }
  0x71   :  { %602 = vmatpush.msrb.mxu3 %v601_v52 }
  0x72   :  { %712 = vmatpush.msra.mxu1 %v1358_v37  ;;  %747 = vmatpush.msra.mxu2 %v545_v13 }
  0x73   :  { %608 = vmatpush.msrb.mxu3 %v607_v61 }
  0x74   :  { %714 = vmatpush.msra.mxu1 %v500_v50  ;;  %751 = vmatpush.msra.mxu2 %v551_v46 }
  0x75   :  { %614 = vmatpush.msrb.mxu3 %v613_v3 }
  0x76   :  { %755 = vmatpush.msra.mxu2 %v557_v38 }
  0x77   :  { %802 = vmatpush.msra.mxu3 %v1181_v4 }
  0x78   :  { %759 = vmatpush.msra.mxu2 %v563_v31 }
  0x79   :  { %804 = vmatpush.msra.mxu3 %v1183_v19 }
  0x7a   :  { %763 = vmatpush.msra.mxu2 %v569_v33 }
  0x7b   :  { %806 = vmatpush.msra.mxu3 %v1185_v20  ;;  %v854_v20 = vld [vmem:[%s1424_s2] ss:$0 sm:$0xff] }
  0x7c   :  { %767 = vmatpush.msra.mxu2 %v575_v43 }
  0x7d   :  { %808 = vmatpush.msra.mxu3 %v1188_v9 }
  0x7e   :  { %771 = vmatpush.msra.mxu2 %v581_v44 }
  0x7f   :  { %810 = vmatpush.msra.mxu3 %v1190_v23 }
  0x80   :  { %775 = vmatpush.msra.mxu2 %v587_v0 }
  0x81   :  { %812 = vmatpush.msra.mxu3 %v1192_v26 }
  0x82   :  { %779 = vmatpush.msra.mxu2 %v593_v7 }
  0x83   :  { %814 = vmatpush.msra.mxu3 %v1219_v51 }
  0x84   :  { %783 = vmatpush.msra.mxu2 %v599_v55 }
  0x85   :  { %816 = vmatpush.msra.mxu3 %v1295_v18 }
  0x86   :  { %787 = vmatpush.msra.mxu2 %v605_v48 }
  0x87   :  { %818 = vmatpush.msra.mxu3 %v1297_v25 }
  0x88   :  { %791 = vmatpush.msra.mxu2 %v611_v63 }
  0x89   :  { %820 = vmatpush.msra.mxu3 %v1299_v56 }
  0x8b   :  { %822 = vmatpush.msra.mxu3 %v1301_v8 }
  0x8d   :  { %824 = vmatpush.msra.mxu3 %v1339_v15 }
  0x8f   :  { %826 = vmatpush.msra.mxu3 %v1347_v22 }
  0x91   :  { %828 = vmatpush.msra.mxu3 %v1356_v36 }
  0x93   :  { %830 = vmatpush.msra.mxu3 %v1358_v37 }
  0x95   :  { %832 = vmatpush.msra.mxu3 %v500_v50 }
  0xaa   :  { %v112_v4 = vpop.f32.mrf.mxu0 }
  0xab   :  { %v113_v23 = vadd.f32 %v854_v20, %v112_v4 }
  0xb2   :  { %v221_v19 = vpop.f32.mrf.mxu1  ;;  %v120_v9 = vpop.f32.mrf.mxu0 }
  0xb3   :  { %v222_v10 = vadd.f32 %v221_v19, %v113_v23  ;;  %v121_v39 = vadd.f32 %v854_v20, %v120_v9 }
  0xb4   :  { %v279_v26 = vpop.f32.mrf.mxu2  ;;  %v323_v34 = vpop.f32.mrf.mxu3 }
  0xb5   :  { %v280_v42 = vadd.f32 %v279_v26, %v222_v10 }
  0xb7   :  { %v324_v45 = vadd.f32 %v323_v34, %v280_v42 }
  0xba   :  { %v225_v29 = vpop.f32.mrf.mxu1 }
  0xbb   :  { %v226_v47 = vadd.f32 %v225_v29, %v121_v39 }
  0xbc   :  { %v284_v51 = vpop.f32.mrf.mxu2  ;;  %v329_v46 = vpop.f32.mrf.mxu3 }
  0xbd   :  { %v285_v13 = vadd.f32 %v284_v51, %v226_v47 }
  0xbf   :  { %v330_v25 = vadd.f32 %v329_v46, %v285_v13 }
  0xca   :  { %v398_v11 = vpop.f32.mrf.mxu0 }
  0xcb   :  { %v399_v53 = vadd.f32 %v398_v11, %v324_v45 }
  0xd2   :  { %v439_v57 = vpop.f32.mrf.mxu1  ;;  %v402_v18 = vpop.f32.mrf.mxu0 }
  0xd3   :  { %v440_v2 = vadd.f32 %v439_v57, %v399_v53  ;;  %v403_v8 = vadd.f32 %v402_v18, %v330_v25 }
  0xd5   :  { %v446_v38 = vmul.f32 0.01, %v440_v2 }
  0xd7   :  { %v448_v56 = vmax.f32 %v440_v2, %v446_v38 }
  0xd9   :  { %v502_v49 = vand.u32 4294901760, %v448_v56 }
  0xda   :  { %v443_v1 = vpop.f32.mrf.mxu1 }
  0xdb   :  { %v503_v12 = vsub.f32 %v448_v56, %v502_v49  ;;  %v444_v32 = vadd.f32 %v443_v1, %v403_v8  ;;  %616 = vmatmul.f32.vlgmr.msrb.gmra.mxu3 %v502_v49 }
  0xdd   :  { %v447_v31 = vmul.f32 0.01, %v444_v32  ;;  %674 = vmatmul.f32.vlgmr.msra.gmra.mxu0 %v503_v12  ;;  %v504_v33 = vand.u32 4294901760, %v503_v12 }
  0xdf   :  { %v449_v43 = vmax.f32 %v444_v32, %v447_v31  ;;  %718 = vmatmul.f32.vlgmr.msra.gmra.mxu1 %v504_v33  ;;  %v505_v44 = vsub.f32 %v503_v12, %v504_v33 }
  0xe1   :  { %v510_v15 = vand.u32 4294901760, %v449_v43  ;;  %v506_v17 = vand.u32 4294901760, %v505_v44 }
  0xe3   :  { %507 = vmatmul.f32.vlgmr.msrb.gmra.mxu2 %v506_v17  ;;  %620 = vmatmul.f32.gmra.mxu3 %v510_v15  ;;  %v511_v5 = vsub.f32 %v449_v43, %v510_v15 }
  0xe5   :  { %679 = vmatmul.f32.gmra.mxu0 %v511_v5  ;;  %v512_v21 = vand.u32 4294901760, %v511_v5 }
  0xe7   :  { %724 = vmatmul.f32.gmra.mxu1 %v512_v21  ;;  %v513_v22 = vsub.f32 %v511_v5, %v512_v21 }
  0xe9   :  { %v514_v28 = vand.u32 4294901760, %v513_v22 }
  0xeb   :  { %515 = vmatmul.f32.gmra.mxu2 %v514_v28  ;;  %834 = vmatmul.f32.vlgmr.msra.gmra.mxu3 %v502_v49 }
  0xf3   :  { %793 = vmatmul.f32.vlgmr.msra.gmra.mxu2 %v502_v49  ;;  %838 = vmatmul.f32.gmra.mxu3 %v510_v15 }
  0xfb   :  { %797 = vmatmul.f32.gmra.mxu2 %v510_v15 }
 0x15a   :  { %v675_v27 = vpop.f32.mrf.mxu0 }
 0x15c   :  { %v719_v40 = vpop.f32.mrf.mxu1 }
 0x15e   :  { %v617_v16 = vpop.f32.mrf.mxu3 }
 0x162   :  { %v680_v6 = vpop.f32.mrf.mxu0 }
 0x164   :  { %v725_v52 = vpop.f32.mrf.mxu1 }
 0x166   :  { %v508_v0 = vpop.f32.mrf.mxu2  ;;  %v621_v36 = vpop.f32.mrf.mxu3 }
 0x167   :  { %v509_v24 = vadd.f32 %v855_v59, %v508_v0 }
 0x169   :  { %v618_v37 = vadd.f32 %v617_v16, %v509_v24 }
 0x16b   :  { %v676_v35 = vadd.f32 %v675_v27, %v618_v37 }
 0x16d   :  { %v720_v55 = vadd.f32 %v719_v40, %v676_v35 }
 0x16e   :  { %v516_v7 = vpop.f32.mrf.mxu2  ;;  %v835_v48 = vpop.f32.mrf.mxu3 }
 0x16f   :  { %v517_v30 = vadd.f32 %v855_v59, %v516_v7 }
 0x171   :  { %v622_v41 = vadd.f32 %v621_v36, %v517_v30 }
 0x173   :  { %v681_v50 = vadd.f32 %v680_v6, %v622_v41 }
 0x175   :  { %v726_v61 = vadd.f32 %v725_v52, %v681_v50 }
 0x176   :  { %v794_v54 = vpop.f32.mrf.mxu2  ;;  %v839_v14 = vpop.f32.mrf.mxu3 }
 0x177   :  { %v795_v60 = vadd.f32 %v794_v54, %v720_v55 }
 0x179   :  { %v836_v58 = vadd.f32 %v835_v48, %v795_v60 }
 0x17b   :  { %842 = vst [vmem:[%s1427_s5] sm:$0xff] %v836_v58 }
 0x17e   :  { %v798_v62 = vpop.f32.mrf.mxu2 }
 0x17f   :  { %v799_v63 = vadd.f32 %v798_v62, %v726_v61 }
 0x181   :  { %v840_v3 = vadd.f32 %v839_v14, %v799_v63 }
 0x183   :  { %843 = vst [vmem:[%s1427_s5 + $0x8] sm:$0xff] %v840_v3 }
 0x184   :  { %848 = vsyncpa [#allocation3], 1 }
 0x185   :  { %849 = vsyncpa [#allocation5], 1 }

</bundles_post_ra>
